<compile_context>
chip_gen: v7x
topology: tpu7x:2x2x1
jax: 0.10.0
libtpu: 0.0.40
codegen_flags: <defaults>
</compile_context>

<pallas_src>
import functools

import jax
import jax.numpy as jnp
from jax.experimental import pallas as pl
from jax.experimental.pallas import tpu as pltpu

DIGIT_LEN = 15
NOISE_DIM = 100
HIDDEN1 = 300
HIDDEN2 = 100


def _round_up(x, m):
    return (x + m - 1) // m * m


def coachnet3_kernel(alpha_ref, noise_ref, w1_ref, b1_ref, w2_ref, b2_ref,
                     w3_ref, b3_ref, out_ref):
    a1 = alpha_ref[0, 0]                       # PReLU slopes from SMEM (scalars)
    a2 = alpha_ref[0, 1]

    x = noise_ref[...]                                                   # (Bp, Dn) bf16

    # Layer 1: bf16 MXU matmul, f32 accumulate; Dropout is identity (eval mode).
    h1 = jnp.dot(x, w1_ref[...], preferred_element_type=jnp.float32) + b1_ref[...]
    h1 = jnp.where(h1 >= 0.0, h1, a1 * h1)                               # PReLU (f32)

    h2 = jnp.dot(h1.astype(jnp.bfloat16), w2_ref[...],
                 preferred_element_type=jnp.float32) + b2_ref[...]
    h2 = jnp.where(h2 >= 0.0, h2, a2 * h2)                               # PReLU (f32)

    logits = jnp.dot(h2.astype(jnp.bfloat16), w3_ref[...],
                     preferred_element_type=jnp.float32) + b3_ref[...]

    # sign(tanh(x)) == sign(x); (sign + 1) / 2 collapses to a single select.
    out_ref[...] = jnp.where(logits > 0.0, 1.0,
                             jnp.where(logits < 0.0, 0.0, 0.5))


def prepare_params(w1, b1, a1, w2, b2, a2, w3, b3):
    """Pad to lane/sublane-aligned tiles and cast weights to bf16, ONCE."""
    d_in, h1_dim = w1.shape
    h2_dim = w2.shape[1]
    d_out = w3.shape[1]

    Dn = _round_up(d_in, 128)
    H1p = _round_up(h1_dim, 128)
    H2p = _round_up(h2_dim, 128)
    Dop = _round_up(d_out, 128)

    bf16, f32 = jnp.bfloat16, jnp.float32
    params = {
        "w1": jnp.zeros((Dn, H1p), bf16).at[:d_in, :h1_dim].set(w1.astype(bf16)),
        "b1": jnp.zeros((1, H1p), f32).at[:, :h1_dim].set(b1.reshape(1, -1).astype(f32)),
        "w2": jnp.zeros((H1p, H2p), bf16).at[:h1_dim, :h2_dim].set(w2.astype(bf16)),
        "b2": jnp.zeros((1, H2p), f32).at[:, :h2_dim].set(b2.reshape(1, -1).astype(f32)),
        "w3": jnp.zeros((H2p, Dop), bf16).at[:h2_dim, :d_out].set(w3.astype(bf16)),
        "b3": jnp.zeros((1, Dop), f32).at[:, :d_out].set(b3.reshape(1, -1).astype(f32)),
        "alphas": jnp.array([[a1, a2]], dtype=f32),
    }
    # Force materialization so per-call cost excludes padding.
    return jax.tree_util.tree_map(jax.block_until_ready, params), d_out


@functools.partial(jax.jit, static_argnames=("d_out",))
def coachnet3_forward(noise, params, *, d_out):
    B, d_in = noise.shape
    Dn, H1p = params["w1"].shape
    H2p, Dop = params["w3"].shape

    # Lane/sublane-aligned padded batch; zero padding is inert through the MLP.
    Bp = _round_up(max(B, 8), 8)
    noise_p = jnp.zeros((Bp, Dn), jnp.bfloat16).at[:B, :d_in].set(
        noise.astype(jnp.bfloat16))

    vmem = pl.BlockSpec(memory_space=pltpu.MemorySpace.VMEM)
    smem = pl.BlockSpec(memory_space=pltpu.MemorySpace.SMEM)

    flops = 2 * Bp * (Dn * H1p + H1p * H2p + H2p * Dop)
    bytes_accessed = (
        noise_p.size * 2
        + params["w1"].size * 2 + params["w2"].size * 2 + params["w3"].size * 2
        + params["b1"].size * 4 + params["b2"].size * 4 + params["b3"].size * 4
        + params["alphas"].size * 4
        + Bp * Dop * 4)

    out = pl.pallas_call(
        coachnet3_kernel,
        out_shape=jax.ShapeDtypeStruct((Bp, Dop), jnp.float32),
        in_specs=[smem, vmem, vmem, vmem, vmem, vmem, vmem, vmem],
        out_specs=vmem,
        cost_estimate=pl.CostEstimate(
            flops=flops, transcendentals=0, bytes_accessed=bytes_accessed),
    )(params["alphas"], noise_p, params["w1"], params["b1"],
      params["w2"], params["b2"], params["w3"], params["b3"])

    return out[:B, :d_out]


if __name__ == "__main__":
    batch_size = 8

    key = jax.random.PRNGKey(0)
    kn, kw1, kb1, kw2, kb2, kw3, kb3 = jax.random.split(key, 7)

    def lin_init(kw, kb, fan_in, fan_out):
        # PyTorch nn.Linear default init: U(-1/sqrt(fan_in), 1/sqrt(fan_in))
        bound = 1.0 / (fan_in ** 0.5)
        w = jax.random.uniform(kw, (fan_in, fan_out), jnp.float32, -bound, bound)
        b = jax.random.uniform(kb, (1, fan_out), jnp.float32, -bound, bound)
        return w, b

    w1, b1 = lin_init(kw1, kb1, NOISE_DIM, HIDDEN1)
    w2, b2 = lin_init(kw2, kb2, HIDDEN1, HIDDEN2)
    w3, b3 = lin_init(kw3, kb3, HIDDEN2, DIGIT_LEN)
    a1 = a2 = 0.25                                      # nn.PReLU() default

    params, d_out = prepare_params(w1, b1, a1, w2, b2, a2, w3, b3)

    noise = jax.random.uniform(kn, (batch_size, NOISE_DIM), jnp.float32)  # torch.rand

    digits = coachnet3_forward(noise, params, d_out=d_out)
    digits = jax.block_until_ready(digits)

    # Pure-JAX f32 reference (unpadded math).
    def prelu(x, a):
        return jnp.where(x >= 0.0, x, a * x)

    h1r = prelu(noise @ w1 + b1, a1)
    h2r = prelu(h1r @ w2 + b2, a2)
    logits_r = h2r @ w3 + b3
    ref = (jnp.sign(jnp.tanh(logits_r)) + 1.0) / 2.0

    assert digits.shape == (batch_size, DIGIT_LEN), digits.shape
    assert bool(jnp.all((digits == 0.0) | (digits == 0.5) | (digits == 1.0)))
    # bf16 matmuls may flip the hard sign near zero; only compare where the
    # f32 reference logit is comfortably away from the decision boundary.
    stable = jnp.abs(logits_r) > 1e-2
    assert bool(jnp.all(jnp.where(stable, digits == ref, True)))

    print("KERNEL_OK")
</pallas_src>

<mosaic_0001>
module attributes {stable_mosaic.version = 11 : i64} {
  func.func @coachnet3_kernel(%arg0: memref<1x2xf32, #tpu.memory_space<smem>>, %arg1: memref<8x128xbf16, #tpu.memory_space<vmem>>, %arg2: memref<128x384xbf16, #tpu.memory_space<vmem>>, %arg3: memref<1x384xf32, #tpu.memory_space<vmem>>, %arg4: memref<384x128xbf16, #tpu.memory_space<vmem>>, %arg5: memref<1x128xf32, #tpu.memory_space<vmem>>, %arg6: memref<128x128xbf16, #tpu.memory_space<vmem>>, %arg7: memref<1x128xf32, #tpu.memory_space<vmem>>, %arg8: memref<8x128xf32, #tpu.memory_space<vmem>>) attributes {dimension_semantics = [], scalar_prefetch = 0 : i64, scratch_operands = 0 : i64, tpu.core_type = #tpu.core_type<tc>} {
    %c0 = arith.constant 0 : index
    %c0_0 = arith.constant 0 : index
    %0 = memref.load %arg0[%c0, %c0_0] : memref<1x2xf32, #tpu.memory_space<smem>>
    %c0_1 = arith.constant 0 : index
    %c1 = arith.constant 1 : index
    %1 = memref.load %arg0[%c0_1, %c1] : memref<1x2xf32, #tpu.memory_space<smem>>
    %c0_2 = arith.constant 0 : index
    %c0_3 = arith.constant 0 : index
    %2 = vector.load %arg1[%c0_2, %c0_3] : memref<8x128xbf16, #tpu.memory_space<vmem>>, vector<8x128xbf16>
    %c0_4 = arith.constant 0 : index
    %c0_5 = arith.constant 0 : index
    %3 = vector.load %arg2[%c0_4, %c0_5] : memref<128x384xbf16, #tpu.memory_space<vmem>>, vector<128x384xbf16>
    %cst = arith.constant dense<0.000000e+00> : vector<8x384xf32>
    %4 = tpu.matmul %2, %3, %cst {dimension_numbers = #tpu.dot_dimension_numbers<[1], [0], [0], [1], [0, 0, 1, 1], [], []>} : vector<8x128xbf16>, vector<128x384xbf16>, vector<8x384xf32> -> vector<8x384xf32>
    %c0_6 = arith.constant 0 : index
    %c0_7 = arith.constant 0 : index
    %5 = vector.load %arg3[%c0_6, %c0_7] : memref<1x384xf32, #tpu.memory_space<vmem>>, vector<1x384xf32>
    %6 = vector.broadcast %5 : vector<1x384xf32> to vector<8x384xf32>
    %7 = arith.addf %4, %6 : vector<8x384xf32>
    %cst_8 = arith.constant 0.000000e+00 : f32
    %8 = vector.broadcast %cst_8 : f32 to vector<8x384xf32>
    %9 = arith.cmpf oge, %7, %8 : vector<8x384xf32>
    %10 = vector.broadcast %0 : f32 to vector<8x384xf32>
    %11 = arith.mulf %10, %7 : vector<8x384xf32>
    %12 = arith.select %9, %7, %11 : vector<8x384xi1>, vector<8x384xf32>
    %13 = arith.truncf %12 : vector<8x384xf32> to vector<8x384xbf16>
    %c0_9 = arith.constant 0 : index
    %c0_10 = arith.constant 0 : index
    %14 = vector.load %arg4[%c0_9, %c0_10] : memref<384x128xbf16, #tpu.memory_space<vmem>>, vector<384x128xbf16>
    %cst_11 = arith.constant dense<0.000000e+00> : vector<8x128xf32>
    %15 = tpu.matmul %13, %14, %cst_11 {dimension_numbers = #tpu.dot_dimension_numbers<[1], [0], [0], [1], [0, 0, 1, 1], [], []>} : vector<8x384xbf16>, vector<384x128xbf16>, vector<8x128xf32> -> vector<8x128xf32>
    %c0_12 = arith.constant 0 : index
    %c0_13 = arith.constant 0 : index
    %16 = vector.load %arg5[%c0_12, %c0_13] : memref<1x128xf32, #tpu.memory_space<vmem>>, vector<1x128xf32>
    %17 = vector.broadcast %16 : vector<1x128xf32> to vector<8x128xf32>
    %18 = arith.addf %15, %17 : vector<8x128xf32>
    %cst_14 = arith.constant 0.000000e+00 : f32
    %19 = vector.broadcast %cst_14 : f32 to vector<8x128xf32>
    %20 = arith.cmpf oge, %18, %19 : vector<8x128xf32>
    %21 = vector.broadcast %1 : f32 to vector<8x128xf32>
    %22 = arith.mulf %21, %18 : vector<8x128xf32>
    %23 = arith.select %20, %18, %22 : vector<8x128xi1>, vector<8x128xf32>
    %24 = arith.truncf %23 : vector<8x128xf32> to vector<8x128xbf16>
    %c0_15 = arith.constant 0 : index
    %c0_16 = arith.constant 0 : index
    %25 = vector.load %arg6[%c0_15, %c0_16] : memref<128x128xbf16, #tpu.memory_space<vmem>>, vector<128x128xbf16>
    %cst_17 = arith.constant dense<0.000000e+00> : vector<8x128xf32>
    %26 = tpu.matmul %24, %25, %cst_17 {dimension_numbers = #tpu.dot_dimension_numbers<[1], [0], [0], [1], [0, 0, 1, 1], [], []>} : vector<8x128xbf16>, vector<128x128xbf16>, vector<8x128xf32> -> vector<8x128xf32>
    %c0_18 = arith.constant 0 : index
    %c0_19 = arith.constant 0 : index
    %27 = vector.load %arg7[%c0_18, %c0_19] : memref<1x128xf32, #tpu.memory_space<vmem>>, vector<1x128xf32>
    %28 = vector.broadcast %27 : vector<1x128xf32> to vector<8x128xf32>
    %29 = arith.addf %26, %28 : vector<8x128xf32>
    %cst_20 = arith.constant 0.000000e+00 : f32
    %30 = vector.broadcast %cst_20 : f32 to vector<8x128xf32>
    %31 = arith.cmpf ogt, %29, %30 : vector<8x128xf32>
    %cst_21 = arith.constant 0.000000e+00 : f32
    %32 = vector.broadcast %cst_21 : f32 to vector<8x128xf32>
    %33 = arith.cmpf olt, %29, %32 : vector<8x128xf32>
    %cst_22 = arith.constant 0.000000e+00 : f32
    %cst_23 = arith.constant 5.000000e-01 : f32
    %34 = vector.broadcast %cst_22 : f32 to vector<8x128xf32>
    %35 = vector.broadcast %cst_23 : f32 to vector<8x128xf32>
    %36 = arith.select %33, %34, %35 : vector<8x128xi1>, vector<8x128xf32>
    %cst_24 = arith.constant 1.000000e+00 : f32
    %37 = vector.broadcast %cst_24 : f32 to vector<8x128xf32>
    %38 = arith.select %31, %37, %36 : vector<8x128xi1>, vector<8x128xf32>
    %c0_25 = arith.constant 0 : index
    %c0_26 = arith.constant 0 : index
    %39 = vector.load %arg8[%c0_25, %c0_26] : memref<8x128xf32, #tpu.memory_space<vmem>>, vector<8x128xf32>
    tpu.vector_store %arg8[%c0_25, %c0_26], %38 {strides = array<i32>} : memref<8x128xf32, #tpu.memory_space<vmem>>, vector<8x128xf32>,
    return
  }
}

</mosaic_0001>

<bundles_post_ra>
// kernel: coachnet3_forward.1
= control target key start
LH: loop header
LB: loop body
LE: loop exit
PB: predicated region body
PF: predicated region fallthrough
CT: control target
= control target key end

     0   :  { %13 = vsyncpa [#allocation5], 0  ;;  %s1286_s0 = inlined_call_operand.vmem [shape: f32[1,2], index: 0, kind: input, shape index: {}]   ;;  %s1287_s1 = inlined_call_operand.vmem [shape: bf16[8,128], index: 1, kind: input, shape index: {}]   ;;  %s1288_s2 = inlined_call_operand.hbm [shape: bf16[128,384], index: 2, kind: input, shape index: {}]   ;;  %s1289_s3 = inlined_call_operand.vmem [shape: f32[1,384], index: 3, kind: input, shape index: {}]   ;;  %s1290_s4 = inlined_call_operand.hbm [shape: bf16[384,128], index: 4, kind: input, shape index: {}]   ;;  %s1291_s5 = inlined_call_operand.vmem [shape: f32[1,128], index: 5, kind: input, shape index: {}]   ;;  %s1292_s6 = inlined_call_operand.hbm [shape: bf16[128,128], index: 6, kind: input, shape index: {}]   ;;  %s1293_s7 = inlined_call_operand.vmem [shape: f32[1,128], index: 7, kind: input, shape index: {}]   ;;  %s1294_s8 = inlined_call_operand.hbm [shape: f32[8,128], index: 8, kind: output, shape index: {}]  }
   0x1   :  { %14 = vsyncpa [#allocation3], 0 }
   0x2   :  { %15 = vsyncpa [#allocation8], 0 }
   0x3   :  { %16 = vsyncpa [#allocation4], 0  ;;  %s1129_s27 = smov [#allocation7]   ;;  %s23_s9 = sshll.u32 %s1286_s0, 4  ;;  %s24_s9 = int_to_ptr.vmem [resolvable:$true] %s23_s9 }
   0x4   :  { %s48_s28 = sshll.u32 %s1129_s27, 4  ;;  %s1021_s12 = scalar_lea.hbm %s1290_s4, 3072  ;;  %s49_s28 = int_to_ptr.vmem [resolvable:$true] %s48_s28 }
   0x5   :  { %p1022_p0 = scmp.ne.s32.totalorder %s1290_s4, %s1021_s12  ;;  %p1025_p1 = scmp.lt.u32.totalorder %s1021_s12, %s1290_s4 }
   0x7   :  { %p1027_p2 = pnand %p1025_p1, %p1022_p0 }
   0x9   :  { %1030 = shalt.err (!%p1027_p2)
}
   0xa   :  { %s1031_s17 = scalar_lea.vmem %s49_s28, 3072  ;;  %p1036_p4 = scmp.lt.s32.totalorder %s49_s28, %s49_s28 }
   0xb   :  { %p1032_p3 = scmp.ne.s32.totalorder %s49_s28, %s1031_s17  ;;  %p1037_p5 = scmp.lt.s32.totalorder %s1031_s17, %s1031_s17 }
   0xd   :  { %p1038_p6 = por %p1037_p5, %p1036_p4 }
   0xf   :  { %p1039_p7 = pnand %p1038_p6, %p1032_p3 }
  0x11   :  { %1042 = shalt.err (!%p1039_p7)
}
  0x12   :  { %s1130_s0 = smov 64   ;;  %s1131_s18 = smov 4  }
  0x13   :  { %54 = dma.hbm_to_vmem [thread:$0]  %s1290_s4, 3072, %s49_s28, [#allocation8], %s1130_s0, %s1130_s0, %s1131_s18  }
  0x14   :  { %s1043_s21 = scalar_lea.vmem %s24_s9, 16  ;;  %p1048_p9 = scmp.lt.s32.totalorder %s24_s9, %s24_s9 }
  0x15   :  { %p1044_p8 = scmp.ne.s32.totalorder %s24_s9, %s1043_s21  ;;  %p1049_p10 = scmp.lt.s32.totalorder %s1043_s21, %s1043_s21 }
  0x17   :  { %p1050_p11 = por %p1049_p10, %p1048_p9 }
  0x19   :  { %p1051_p12 = pnand %p1050_p11, %p1044_p8 }
  0x1b   :  { %1054 = shalt.err (!%p1051_p12)
}
  0x1c   :  { %s1132_s22 = smov [#allocation2]   ;;  %s1133_s23 = smov [#allocation6]  }
  0x1d   :  { %26 = dma.vmem_to_smem %s24_s9, 16, %s1132_s22, [#allocation5]  }
  0x1e   :  { %s34_s24 = sshll.u32 %s1133_s23, 4  ;;  %s1055_s27 = scalar_lea.hbm %s1288_s2, 3072  ;;  %s35_s24 = int_to_ptr.vmem [resolvable:$true] %s34_s24 }
  0x1f   :  { %p1056_p13 = scmp.ne.s32.totalorder %s1288_s2, %s1055_s27  ;;  %p1059_p0 = scmp.lt.u32.totalorder %s1055_s27, %s1288_s2 }
  0x21   :  { %p1061_p1 = pnand %p1059_p0, %p1056_p13 }
  0x23   :  { %1064 = shalt.err (!%p1061_p1)
}
  0x24   :  { %s1065_s10 = scalar_lea.vmem %s35_s24, 3072  ;;  %p1070_p3 = scmp.lt.s32.totalorder %s35_s24, %s35_s24 }
  0x25   :  { %p1066_p2 = scmp.ne.s32.totalorder %s35_s24, %s1065_s10  ;;  %p1071_p4 = scmp.lt.s32.totalorder %s1065_s10, %s1065_s10 }
  0x27   :  { %p1072_p5 = por %p1071_p4, %p1070_p3 }
  0x29   :  { %p1073_p6 = pnand %p1072_p5, %p1066_p2 }
  0x2b   :  { %1076 = shalt.err (!%p1073_p6)
}
  0x2c   :  { %s1134_s9 = smov 192   ;;  %s1135_s11 = smov 12  }
  0x2d   :  { %40 = dma.hbm_to_vmem [thread:$0]  %s1288_s2, 3072, %s35_s24, [#allocation3], %s1134_s9, %s1134_s9, %s1135_s11  }
  0x2e   :  { %s1136_s14 = smov [#allocation9]   ;;  %s1077_s19 = scalar_lea.hbm %s1292_s6, 1024 }
  0x2f   :  { %s62_s15 = sshll.u32 %s1136_s14, 4  ;;  %p1078_p7 = scmp.ne.s32.totalorder %s1292_s6, %s1077_s19  ;;  %s63_s15 = int_to_ptr.vmem [resolvable:$true] %s62_s15 }
  0x30   :  { %p1081_p8 = scmp.lt.u32.totalorder %s1077_s19, %s1292_s6 }
  0x32   :  { %p1083_p9 = pnand %p1081_p8, %p1078_p7 }
  0x34   :  { %1086 = shalt.err (!%p1083_p9)
}
  0x35   :  { %s1087_s25 = scalar_lea.vmem %s63_s15, 1024  ;;  %p1092_p11 = scmp.lt.s32.totalorder %s63_s15, %s63_s15 }
  0x36   :  { %p1088_p10 = scmp.ne.s32.totalorder %s63_s15, %s1087_s25  ;;  %p1093_p12 = scmp.lt.s32.totalorder %s1087_s25, %s1087_s25 }
  0x38   :  { %p1094_p13 = por %p1093_p12, %p1092_p11 }
  0x3a   :  { %p1095_p0 = pnand %p1094_p13, %p1088_p10 }
  0x3c   :  { %1098 = shalt.err (!%p1095_p0)
}
  0x3d   :  { %68 = dma.hbm_to_vmem [thread:$0]  %s1292_s6, 1024, %s63_s15, [#allocation8], %s1130_s0, %s1130_s0, %s1131_s18  }
  0x3e   :  { %1121 = dma.done.wait [#allocation5], 16  }
  0x3f   :  { %1122 = vsyncadd [#allocation5], 4294967280 }
  0x40   :  { %1123 = dma.done.wait [#allocation3], 3072  }
  0x41   :  { %1124 = vsyncadd [#allocation3], 4294964224 }
  0x42   :  { %1125 = dma.done.wait [#allocation8], 4096  }
  0x43   :  { %1126 = vsyncadd [#allocation8], 4294963200 }
  0x44   :  { %83 = sfence }
  0x45   :  { %v957_v0 = vld [vmem:[#allocation6 + $0x4] ss:$12 sps:$4 sm:$0xff]   ;;  %v959_v1 = vld [vmem:[#allocation6] ss:$12 sps:$4 sm:$0xff]   ;;  %v1137_v2 = vmov 0.0   ;;  %v1138_v3 = vmov 0   ;;  %v122_v51 = vlaneseq }
  0x46   :  { %884 = vmatprep.subr.bf16.mxu1 %v1137_v2  ;;  %297 = vmatprep.mubr.bf16.mxu0 %v1138_v3  ;;  %v960_v4 = vld [vmem:[#allocation6 + $0x8] ss:$12 sps:$4 sm:$0xff]   ;;  %v963_v6 = vld [vmem:[#allocation6 + $0x18] ss:$12 sps:$4 sm:$0xff]   ;;  %vm1139_vm0 = vmmov 0  }
  0x47   :  { %265 = vmatprep.subr.bf16.mxu0 %v957_v0  ;;  %v961_v5 = vld [vmem:[#allocation6 + $0x1c] ss:$12 sps:$4 sm:$0xff]   ;;  %900 = vmatprep.mubr.msk.bf16.mxu1 %vm1139_vm0, %v1137_v2  ;;  %v964_v7 = vld [vmem:[#allocation6 + $0x20] ss:$12 sps:$4 sm:$0xff]   ;;  %v968_v10 = vld [vmem:[#allocation6 + $0x38] ss:$12 sps:$4 sm:$0xff]  }
  0x48   :  { %266 = vmatpush1.bf16.msra.mxu0 %v959_v1  ;;  %885 = vmatpush3.bf16.msra.mxu1 %v960_v4  ;;  %v965_v8 = vld [vmem:[#allocation6 + $0x34] ss:$12 sps:$4 sm:$0xff]   ;;  %v967_v9 = vld [vmem:[#allocation6 + $0x30] ss:$12 sps:$4 sm:$0xff]   ;;  %v969_v11 = vld [vmem:[#allocation6 + $0x4c] ss:$12 sps:$4 sm:$0xff]  }
  0x49   :  { %267 = vmatprep.subr.bf16.mxu0 %v961_v5  ;;  %886 = vmatprep.subr.bf16.mxu1 %v1137_v2  ;;  %v971_v12 = vld [vmem:[#allocation6 + $0x48] ss:$12 sps:$4 sm:$0xff]   ;;  %v972_v13 = vld [vmem:[#allocation6 + $0x50] ss:$12 sps:$4 sm:$0xff]   ;;  %v975_v15 = vld [vmem:[#allocation6 + $0x60] ss:$12 sps:$4 sm:$0xff]  }
  0x4a   :  { %v973_v14 = vld [vmem:[#allocation6 + $0x64] ss:$12 sps:$4 sm:$0xff]   ;;  %v976_v16 = vld [vmem:[#allocation6 + $0x68] ss:$12 sps:$4 sm:$0xff]   ;;  %v980_v19 = vld [vmem:[#allocation6 + $0x80] ss:$12 sps:$4 sm:$0xff]  }
  0x4b   :  { %v977_v17 = vld [vmem:[#allocation6 + $0x7c] ss:$12 sps:$4 sm:$0xff]   ;;  %v979_v18 = vld [vmem:[#allocation6 + $0x78] ss:$12 sps:$4 sm:$0xff]   ;;  %v981_v20 = vld [vmem:[#allocation6 + $0x94] ss:$12 sps:$4 sm:$0xff]  }
  0x4c   :  { %268 = vmatpush1.bf16.msra.mxu0 %v963_v6  ;;  %887 = vmatpush3.bf16.msra.mxu1 %v964_v7  ;;  %v983_v21 = vld [vmem:[#allocation6 + $0x90] ss:$12 sps:$4 sm:$0xff]   ;;  %v984_v22 = vld [vmem:[#allocation6 + $0x98] ss:$12 sps:$4 sm:$0xff]   ;;  %v987_v24 = vld [vmem:[#allocation6 + $0xa8] ss:$12 sps:$4 sm:$0xff]  }
  0x4d   :  { %269 = vmatprep.subr.bf16.mxu0 %v965_v8  ;;  %888 = vmatprep.subr.bf16.mxu1 %v1137_v2  ;;  %v985_v23 = vld [vmem:[#allocation6 + $0xac] ss:$12 sps:$4 sm:$0xff]   ;;  %v988_v25 = vld [vmem:[#allocation6 + $0xb0] ss:$12 sps:$4 sm:$0xff]   ;;  %v989_v26 = vld [vmem:[#allocation7 + $0x40] sm:$0xff]   ;;  %v123_v52 = vshrl.u32 %v122_v51, 7 }
  0x4e   :  { %v87_v27 = vld [vmem:[%s1287_s1] sm:$0xf]  ;;  %v992_v30 = vld [vmem:[#allocation7 + $0x48] sm:$0xff]   ;;  %v995_v33 = vld [vmem:[#allocation7 + $0x50] sm:$0xff]   ;;  %s85_s1 = sld [smem:[#allocation2]] }
  0x4f   :  { %v990_v28 = vld [vmem:[#allocation7] sm:$0xff]   ;;  %v993_v31 = vld [vmem:[#allocation7 + $0x8] sm:$0xff]   ;;  %v996_v34 = vld [vmem:[#allocation7 + $0x10] sm:$0xff]   ;;  %v124_v53 = vsub.s32 0, %v123_v52  ;;  %v128_v55 = vsub.s32 1, %v123_v52  ;;  %v132_v56 = vsub.s32 2, %v123_v52 }
  0x50   :  { %270 = vmatpush1.bf16.msra.mxu0 %v967_v9  ;;  %889 = vmatpush3.bf16.msra.mxu1 %v968_v10  ;;  %v991_v29 = vld [vmem:[#allocation7 + $0x80] sm:$0xff]   ;;  %v994_v32 = vld [vmem:[#allocation7 + $0x88] sm:$0xff]   ;;  %v997_v35 = vld [vmem:[#allocation7 + $0x90] sm:$0xff]  }
  0x51   :  { %271 = vmatprep.subr.bf16.mxu0 %v969_v11  ;;  %890 = vmatprep.subr.bf16.mxu1 %v1137_v2  ;;  %v998_v36 = vld [vmem:[#allocation7 + $0x58] sm:$0xff]   ;;  %v1001_v39 = vld [vmem:[#allocation7 + $0x60] sm:$0xff]   ;;  %v1004_v42 = vld [vmem:[#allocation7 + $0x68] sm:$0xff]  }
  0x52   :  { %v999_v37 = vld [vmem:[#allocation7 + $0x18] sm:$0xff]   ;;  %v1002_v40 = vld [vmem:[#allocation7 + $0x20] sm:$0xff]   ;;  %v1005_v43 = vld [vmem:[#allocation7 + $0x28] sm:$0xff]  }
  0x53   :  { %v1000_v38 = vld [vmem:[#allocation7 + $0x98] sm:$0xff]   ;;  %v1003_v41 = vld [vmem:[#allocation7 + $0xa0] sm:$0xff]   ;;  %v1006_v44 = vld [vmem:[#allocation7 + $0xa8] sm:$0xff]  }
  0x54   :  { %272 = vmatpush1.bf16.msra.mxu0 %v971_v12  ;;  %891 = vmatpush3.bf16.msra.mxu1 %v972_v13  ;;  %v1007_v45 = vld [vmem:[#allocation7 + $0x70] sm:$0xff]   ;;  %v1010_v48 = vld [vmem:[#allocation7 + $0x78] sm:$0xff]   ;;  %v120_v54 = vld [vmem:[%s1289_s3] sm:$0x7]  ;;  %v349_v61 = vstv %s85_s1  ;;  %s776_s3 = sld [smem:[#allocation2 + $0x1]] }
  0x55   :  { %273 = vmatprep.subr.bf16.mxu0 %v973_v14  ;;  %892 = vmatprep.subr.bf16.mxu1 %v1137_v2  ;;  %v1008_v46 = vld [vmem:[#allocation7 + $0x30] sm:$0xff]   ;;  %v1011_v49 = vld [vmem:[#allocation7 + $0x38] sm:$0xff]   ;;  %v125_v57 = vrot.slane %v120_v54, %v124_v53  ;;  %v129_v58 = vrot.slane %v120_v54, %v128_v55  ;;  %v133_v59 = vrot.slane %v120_v54, %v132_v56 }
  0x56   :  { %v1009_v47 = vld [vmem:[#allocation7 + $0xb0] sm:$0xff]   ;;  %v1012_v50 = vld [vmem:[#allocation7 + $0xb8] sm:$0xff]  }
  0x58   :  { %274 = vmatpush1.bf16.msra.mxu0 %v975_v15  ;;  %893 = vmatpush3.bf16.msra.mxu1 %v976_v16 }
  0x59   :  { %275 = vmatprep.subr.bf16.mxu0 %v977_v17  ;;  %894 = vmatprep.subr.bf16.mxu1 %v1137_v2  ;;  %v1013_v17 = vld [vmem:[#allocation9] sm:$0xff]  }
  0x5c   :  { %276 = vmatpush1.bf16.msra.mxu0 %v979_v18  ;;  %895 = vmatpush3.bf16.msra.mxu1 %v980_v19  ;;  %v1014_v19 = vld [vmem:[#allocation9 + $0x8] sm:$0xff]  }
  0x5d   :  { %277 = vmatprep.subr.bf16.mxu0 %v981_v20  ;;  %896 = vmatprep.subr.bf16.mxu1 %v1137_v2  ;;  %v1015_v20 = vld [vmem:[#allocation9 + $0x10] sm:$0xff]  }
  0x60   :  { %278 = vmatpush1.bf16.msra.mxu0 %v983_v21  ;;  %897 = vmatpush3.bf16.msra.mxu1 %v984_v22  ;;  %v1016_v21 = vld [vmem:[#allocation9 + $0x18] sm:$0xff]   ;;  %v1017_v22 = vld [vmem:[#allocation9 + $0x20] sm:$0xff]  }
  0x61   :  { %279 = vmatprep.subr.bf16.mxu0 %v985_v23  ;;  %898 = vmatprep.subr.bf16.mxu1 %v1137_v2  ;;  %v1018_v23 = vld [vmem:[#allocation9 + $0x28] sm:$0xff]  }
  0x64   :  { %280 = vmatpush1.bf16.msra.mxu0 %v987_v24  ;;  %899 = vmatpush3.bf16.msra.mxu1 %v988_v25  ;;  %v1019_v24 = vld [vmem:[#allocation9 + $0x30] sm:$0xff]   ;;  %v1020_v25 = vld [vmem:[#allocation9 + $0x38] sm:$0xff]  }
  0x65   :  { %844 = vmatprep.subr.bf16.mxu0 %v989_v26  ;;  %904 = vmatprep.subr.bf16.mxu1 %v1137_v2 }
  0x67   :  { %298 = vmatmul.mubr.bf16.vlgmr.msra.gmra.mrb[0].mxu0 %v87_v27  ;;  %901 = vmatmul.mubr.bf16.vlgmr.msra.gmra.mrb[0].mxu1 %v87_v27 }
  0x68   :  { %845 = vmatpush3.bf16.msra.mxu0 %v990_v28  ;;  %905 = vmatpush3.bf16.msra.mxu1 %v991_v29  ;;  %v801_v29 = vld [vmem:[%s1291_s5] ss:$0 sm:$0xff]  ;;  %s1140_s5 = smov [#allocation10]  }
  0x69   :  { %846 = vmatprep.subr.bf16.mxu0 %v992_v30  ;;  %906 = vmatprep.subr.bf16.mxu1 %v1137_v2  ;;  %s765_s28 = sshll.u32 %s1140_s5, 4  ;;  %s766_s28 = int_to_ptr.vmem [resolvable:$true] %s765_s28 }
  0x6a   :  { %920 = vmatprep.mubr.msk.bf16.mxu1 %vm1139_vm0, %v1137_v2  ;;  %s1099_s10 = scalar_lea.vmem %s766_s28, 128  ;;  %p1104_p2 = scmp.lt.s32.totalorder %s766_s28, %s766_s28 }
  0x6b   :  { %p1100_p1 = scmp.ne.s32.totalorder %s766_s28, %s1099_s10  ;;  %p1105_p3 = scmp.lt.s32.totalorder %s1099_s10, %s1099_s10 }
  0x6c   :  { %847 = vmatpush3.bf16.msra.mxu0 %v993_v31  ;;  %907 = vmatpush3.bf16.msra.mxu1 %v994_v32 }
  0x6d   :  { %848 = vmatprep.subr.bf16.mxu0 %v995_v33  ;;  %908 = vmatprep.subr.bf16.mxu1 %v1137_v2  ;;  %p1106_p4 = por %p1105_p3, %p1104_p2 }
  0x6f   :  { %p1107_p5 = pnand %p1106_p4, %p1100_p1 }
  0x70   :  { %849 = vmatpush3.bf16.msra.mxu0 %v996_v34  ;;  %909 = vmatpush3.bf16.msra.mxu1 %v997_v35 }
  0x71   :  { %850 = vmatprep.subr.bf16.mxu0 %v998_v36  ;;  %910 = vmatprep.subr.bf16.mxu1 %v1137_v2 }
  0x74   :  { %851 = vmatpush3.bf16.msra.mxu0 %v999_v37  ;;  %911 = vmatpush3.bf16.msra.mxu1 %v1000_v38  ;;  %v639_v37 = vstv %s776_s3 }
  0x75   :  { %852 = vmatprep.subr.bf16.mxu0 %v1001_v39  ;;  %912 = vmatprep.subr.bf16.mxu1 %v1137_v2 }
  0x78   :  { %853 = vmatpush3.bf16.msra.mxu0 %v1002_v40  ;;  %913 = vmatpush3.bf16.msra.mxu1 %v1003_v41  ;;  %v826_v41 = vld [vmem:[%s1293_s7] ss:$0 sm:$0xff] }
  0x79   :  { %854 = vmatprep.subr.bf16.mxu0 %v1004_v42  ;;  %914 = vmatprep.subr.bf16.mxu1 %v1137_v2 }
  0x7c   :  { %855 = vmatpush3.bf16.msra.mxu0 %v1005_v43  ;;  %915 = vmatpush3.bf16.msra.mxu1 %v1006_v44 }
  0x7d   :  { %916 = vmatprep.subr.bf16.mxu1 %v1137_v2  ;;  %856 = vmatprep.subr.bf16.mxu0 %v1007_v45 }
  0x80   :  { %857 = vmatpush3.bf16.msra.mxu0 %v1008_v46  ;;  %917 = vmatpush3.bf16.msra.mxu1 %v1009_v47  ;;  %v1141_v47 = vmov 0.5  }
  0x81   :  { %918 = vmatprep.subr.bf16.mxu1 %v1137_v2  ;;  %858 = vmatprep.subr.bf16.mxu0 %v1010_v48 }
  0x84   :  { %859 = vmatpush3.bf16.msra.mxu0 %v1011_v49  ;;  %919 = vmatpush3.bf16.msra.mxu1 %v1012_v50 }
  0x85   :  { %924 = vmatprep.subr.bf16.mxu0 %v1137_v2 }
 0x13a   :  { %v299_v60 = vpop.f32.mrb[0].mxu0  ;;  %v340_v0 = vpop.f32.mrb[0].mxu1 }
 0x13b   :  { %v300_v62 = vadd.f32 %v299_v60, %v125_v57  ;;  %v301_v63 = vpop.f32.mrb[1].mxu0  ;;  %v341_v4 = vadd.f32 %v340_v0, %v133_v59  ;;  %v902_v5 = vpop.f32.mrb[1].mxu1 }
 0x13c   :  { %v302_v1 = vadd.f32 %v301_v63, %v129_v58  ;;  %v303_v3 = vpop.f32.mrb[2].mxu0  ;;  %v343_v8 = vpop.f32.mrb[2].mxu1 }
 0x13d   :  { %vm346_vm1 = vcmp.ge.f32.partialorder %v300_v62, 0.0  ;;  %v350_v6 = vmul.f32 %v349_v61, %v300_v62  ;;  %v304_v7 = vpop.f32.mrb[3].mxu0  ;;  %vm348_vm3 = vcmp.ge.f32.partialorder %v341_v4, 0.0  ;;  %v352_v10 = vmul.f32 %v349_v61, %v341_v4  ;;  %v903_v11 = vpop.f32.mrb[3].mxu1 }
 0x13e   :  { %vm347_vm2 = vcmp.ge.f32.partialorder %v302_v1, 0.0  ;;  %v351_v9 = vmul.f32 %v349_v61, %v302_v1 }
 0x13f   :  { %v353_v12 = vsel %vm346_vm1, %v300_v62, %v350_v6  ;;  %v355_v13 = vsel %vm348_vm3, %v341_v4, %v352_v10 }
 0x140   :  { %v354_v14 = vsel %vm347_vm2, %v302_v1, %v351_v9  ;;  %v358_v15 = vpack.c.bf16 %v355_v13, %v355_v13  ;;  %v356_v18 = vpack.c.bf16 %v353_v12, %v353_v12 }
 0x141   :  { %v357_v16 = vpack.c.bf16 %v354_v14, %v354_v14 }
 0x142   :  { %921 = vmatmul.mubr.bf16.vlgmr.msra.gmra.mrb[4].mxu1 %v358_v15 }
 0x143   :  { %590 = vmatprep.mubr.bf16.mxu0 %v357_v16 }
 0x144   :  { %591 = vmatmul.mubr.bf16.vlgmr.msra.gmra.mrb[4].mxu0 %v356_v18 }
 0x145   :  { %925 = vmatpush3.bf16.msra.mxu0 %v1013_v17  ;;  %940 = vmatprep.mubr.msk.bf16.mxu0 %vm1139_vm0, %v1137_v2 }
 0x146   :  { %926 = vmatprep.subr.bf16.mxu0 %v1137_v2 }
 0x149   :  { %927 = vmatpush3.bf16.msra.mxu0 %v1014_v19 }
 0x14a   :  { %928 = vmatprep.subr.bf16.mxu0 %v1137_v2 }
 0x14d   :  { %929 = vmatpush3.bf16.msra.mxu0 %v1015_v20 }
 0x14e   :  { %930 = vmatprep.subr.bf16.mxu0 %v1137_v2 }
 0x151   :  { %931 = vmatpush3.bf16.msra.mxu0 %v1016_v21 }
 0x152   :  { %932 = vmatprep.subr.bf16.mxu0 %v1137_v2 }
 0x155   :  { %933 = vmatpush3.bf16.msra.mxu0 %v1017_v22 }
 0x156   :  { %934 = vmatprep.subr.bf16.mxu0 %v1137_v2 }
 0x159   :  { %935 = vmatpush3.bf16.msra.mxu0 %v1018_v23 }
 0x15a   :  { %936 = vmatprep.subr.bf16.mxu0 %v1137_v2 }
 0x15d   :  { %937 = vmatpush3.bf16.msra.mxu0 %v1019_v24 }
 0x15e   :  { %938 = vmatprep.subr.bf16.mxu0 %v1137_v2 }
 0x161   :  { %939 = vmatpush3.bf16.msra.mxu0 %v1020_v25 }
 0x215   :  { %v632_v26 = vpop.f32.mrb[4].mxu1 }
 0x216   :  { %v922_v28 = vpop.f32.mrb[5].mxu1 }
 0x217   :  { %v860_v27 = vpop.f32.mrb[4].mxu0  ;;  %v635_v31 = vpop.f32.mrb[6].mxu1 }
 0x218   :  { %v861_v30 = vpop.f32.mrb[5].mxu0  ;;  %v923_v34 = vpop.f32.mrb[7].mxu1 }
 0x219   :  { %v862_v32 = vadd.f32 %v861_v30, %v860_v27  ;;  %v863_v33 = vpop.f32.mrb[6].mxu0 }
 0x21a   :  { %v864_v35 = vpop.f32.mrb[7].mxu0 }
 0x21b   :  { %v593_v36 = vadd.f32 %v862_v32, %v801_v29 }
 0x21d   :  { %v633_v38 = vadd.f32 %v632_v26, %v593_v36 }
 0x21f   :  { %vm638_vm4 = vcmp.ge.f32.partialorder %v633_v38, 0.0  ;;  %v640_v2 = vmul.f32 %v639_v37, %v633_v38 }
 0x221   :  { %v641_v39 = vsel %vm638_vm4, %v633_v38, %v640_v2 }
 0x222   :  { %v642_v40 = vpack.c.bf16 %v641_v39, %v641_v39 }
 0x224   :  { %941 = vmatmul.mubr.bf16.vlgmr.msra.gmra.mrb[8].mxu0 %v642_v40 }
 0x2f7   :  { %v748_v42 = vpop.f32.mrb[8].mxu0 }
 0x2f8   :  { %v749_v43 = vadd.f32 %v826_v41, %v748_v42  ;;  %v942_v44 = vpop.f32.mrb[9].mxu0 }
 0x2f9   :  { %v751_v45 = vpop.f32.mrb[10].mxu0 }
 0x2fa   :  { %vm755_vm5 = vcmp.lt.f32.partialorder %v749_v43, 0.0  ;;  %v943_v46 = vpop.f32.mrb[11].mxu0  ;;  %vm754_vm6 = vcmp.gt.f32.partialorder %v749_v43, 0.0 }
 0x2fb   :  { %v756_v48 = vsel %vm755_vm5, 0.0, %v1141_v47 }
 0x2fc   :  { %v757_v49 = vsel %vm754_vm6, 1.0, %v756_v48 }
 0x2fd   :  { %758 = vst [vmem:[#allocation10] sm:$0xff] %v757_v49 }
 0x2fe   :  { %1110 = shalt.err (!%p1107_p5)
}
 0x2ff   :  { %s1111_s11 = scalar_lea.hbm %s1294_s8, 128 }
 0x300   :  { %p1112_p6 = scmp.ne.s32.totalorder %s1294_s8, %s1111_s11  ;;  %p1115_p7 = scmp.lt.u32.totalorder %s1111_s11, %s1294_s8 }
 0x302   :  { %p1117_p8 = pnand %p1115_p7, %p1112_p6 }
 0x304   :  { %1120 = shalt.err (!%p1117_p8)
}
 0x305   :  { %768 = dma.vmem_to_hbm [thread:$0]  %s766_s28, 128, %s1294_s8, [#allocation4]  }
 0x306   :  { %1127 = dma.done.wait [#allocation4], 128  }
 0x307   :  { %1128 = vsyncadd [#allocation4], 4294967168 }
 0x308   :  { %772 = vsyncpa [#allocation3], 1 }
 0x309   :  { %773 = vsyncpa [#allocation8], 1 }
 0x30a   :  { %774 = vsyncpa [#allocation4], 1 }
 0x30b   :  { %775 = vsyncpa [#allocation5], 1 }

</bundles_post_ra>
